<compile_context>
chip_gen: v5e
topology: v5e:2x2
jax: 0.10.0
libtpu: 0.0.40
codegen_flags: <defaults>
</compile_context>

<pallas_src>
import jax
import jax.numpy as jnp
from jax.experimental import pallas as pl
from jax.experimental.pallas import tpu as pltpu


def _elem_loss(p, g):
    """(p-0)^2*(g==0.1)*0.1 + (p-1)^2*(g==1)*1, accumulated in f32.

    gt is compared in ITS OWN dtype (exactly what `gt == 0.1` does in torch),
    then everything is promoted to f32 for the arithmetic — this lets bf16
    inputs stream at half the HBM bytes without breaking the 0.1 branch.
    """
    is_fg = g == jnp.asarray(1.0, g.dtype)
    is_bg = g == jnp.asarray(0.1, g.dtype)
    pf = p.astype(jnp.float32)
    w = jnp.where(is_fg, jnp.float32(1.0),
                  jnp.where(is_bg, jnp.float32(0.1), jnp.float32(0.0)))
    d = jnp.where(is_fg, pf - jnp.float32(1.0), pf)
    return w * d * d


def _loc_loss_kernel(pred_ref, gt_ref, out_ref):
    # out_ref: (8, L) f32 partial-sum accumulator for this parallel partition.
    # Its block index is constant across the inner ("arbitrary") axis, so it
    # stays resident in VMEM and acts as the accumulator.
    i = pl.program_id(1)

    @pl.when(i == 0)
    def _():
        out_ref[...] = jnp.zeros_like(out_ref)

    loss = _elem_loss(pred_ref[...], gt_ref[...])

    # Sublane-group partial reduce: (tm, L) -> (tm//8, 8, L) -> (8, L).
    # Last dim unchanged -> pure VPU vreg adds, no cross-lane movement.
    tm, lane = loss.shape
    out_ref[...] += loss.reshape(tm // 8, 8, lane).sum(axis=0)


def _tpu_kind():
    try:
        return jax.devices()[0].device_kind.lower()
    except Exception:
        return ""


def loc_loss(pred, gt, *, row_tile=None, parallel=None):
    """pred, gt: same-shape float arrays (e.g. NCHW). Returns scalar f32 loss."""
    assert pred.shape == gt.shape
    total = int(pred.size)

    kind = _tpu_kind()
    is_v7 = "v7" in kind
    if parallel is None:
        parallel = 2 if is_v7 else 1        # second TensorCore only on v7x
    if row_tile is None:
        row_tile = 2048 if is_v7 else 1024  # >=2 MiB/input/step (4 MiB on v7x)
    P = parallel

    pred_flat = pred.reshape(-1)
    gt_flat = gt.reshape(-1)

    # Lane width: prefer the largest L that (a) divides `total` (so the flat ->
    # (m, L) reshape is a free bitcast — no padded / sliced HBM copy) and
    # (b) leaves at least one (8, L) tile per parallel partition.
    L = None
    sliced = False
    for cand in (512, 256, 128):
        if total % cand == 0 and total // cand >= 8 * P:
            L = cand
            break
    if L is None:
        for cand in (512, 256, 128):
            if total // cand >= 8 * P:
                L = cand
                sliced = True
                break
    if L is None:
        # Tiny input: a kernel launch is pure overhead.
        return jnp.sum(_elem_loss(pred_flat, gt_flat)) / jnp.float32(total)

    m_full = total // L
    tm = min(row_tile, (m_full // P) // 8 * 8)   # multiple of 8, >= 8
    steps = m_full // (P * tm)                   # >= 1 by construction
    m_main = P * steps * tm                      # rows covered by the kernel

    if sliced:
        # total % L != 0 (rare for NCHW heatmaps): the prefix slice costs one
        # extra pass over the main body; the < L element tail is summed below.
        pred2 = pred_flat[: m_full * L].reshape(m_full, L)
        gt2 = gt_flat[: m_full * L].reshape(m_full, L)
    else:
        pred2 = pred_flat.reshape(m_full, L)     # free bitcast
        gt2 = gt_flat.reshape(m_full, L)

    in_itemsize = pred.dtype.itemsize + gt.dtype.itemsize
    per_buf = tm * L * max(pred.dtype.itemsize, gt.dtype.itemsize)
    vmem_need = 2 * 2 * per_buf + 4 * P * 8 * L * 4 + (2 << 20)
    vmem_limit = int(min(max(vmem_need * 3 // 2, 16 << 20), 48 << 20))

    partials = pl.pallas_call(
        _loc_loss_kernel,
        out_shape=jax.ShapeDtypeStruct((P * 8, L), jnp.float32),
        grid_spec=pltpu.PrefetchScalarGridSpec(
            num_scalar_prefetch=0,
            grid=(P, steps),
            in_specs=[
                pl.BlockSpec((tm, L), lambda p, i: (p * steps + i, 0)),
                pl.BlockSpec((tm, L), lambda p, i: (p * steps + i, 0)),
            ],
            out_specs=pl.BlockSpec((8, L), lambda p, i: (p, 0)),
        ),
        compiler_params=pltpu.CompilerParams(
            dimension_semantics=("parallel", "arbitrary"),
            vmem_limit_bytes=vmem_limit,
        ),
        cost_estimate=pl.CostEstimate(
            flops=6 * m_main * L,
            transcendentals=0,
            bytes_accessed=m_main * L * in_itemsize + P * 8 * L * 4,
        ),
    )(pred2, gt2)

    acc = jnp.sum(partials)

    # Ragged tails handled with plain jnp — no padded full-tensor round trips.
    if m_main < m_full:                      # leftover full rows (< P*tm rows)
        acc = acc + jnp.sum(_elem_loss(pred2[m_main:], gt2[m_main:]))
    if m_full * L < total:                   # sub-row tail (< L elements)
        acc = acc + jnp.sum(_elem_loss(pred_flat[m_full * L:],
                                       gt_flat[m_full * L:]))

    return acc / jnp.float32(total)


def loc_loss_ref(pred, gt):
    loss = (pred - 0.0) ** 2 * (gt == 0.1) * 0.1 + (pred - 1.0) ** 2 * (gt == 1.0) * 1.0
    return loss.mean(axis=3).mean(axis=2).mean(axis=1).mean(axis=0)


if __name__ == "__main__":
    key = jax.random.PRNGKey(0)
    k1, k2, k3 = jax.random.split(key, 3)

    # Primary test: N,C,H,W heatmap-like tensors with gt containing exactly
    # the values the loss keys on (0.1 background, 1.0 foreground, 0.0 other).
    N, C, H, W = 2, 4, 16, 16
    pred = jax.random.uniform(k1, (N, C, H, W), dtype=jnp.float32)
    choice = jax.random.randint(k2, (N, C, H, W), 0, 3)
    gt = jnp.where(
        choice == 0, jnp.float32(0.1),
        jnp.where(choice == 1, jnp.float32(1.0), jnp.float32(0.0)),
    )

    loss_fn = jax.jit(loc_loss)
    out = jax.block_until_ready(loss_fn(pred, gt))
    ref = loc_loss_ref(pred, gt)
    assert jnp.allclose(out, ref, rtol=1e-5, atol=1e-6), (out, ref)

    # Secondary test: a shape whose row count is not a multiple of the tile,
    # exercising the jnp tail path (no padding, no extra HBM passes).
    pred_b = jax.random.uniform(k3, (2, 3, 16, 16), dtype=jnp.float32)
    choice_b = jax.random.randint(k2, (2, 3, 16, 16), 0, 3)
    gt_b = jnp.where(
        choice_b == 0, jnp.float32(0.1),
        jnp.where(choice_b == 1, jnp.float32(1.0), jnp.float32(0.0)),
    )
    out_b = jax.block_until_ready(jax.jit(loc_loss)(pred_b, gt_b))
    ref_b = loc_loss_ref(pred_b, gt_b)
    assert jnp.allclose(out_b, ref_b, rtol=1e-5, atol=1e-6), (out_b, ref_b)

    print("KERNEL_OK")
</pallas_src>

<mosaic_0001>
module attributes {stable_mosaic.version = 11 : i64} {
  func.func @_loc_loss_kernel(%arg0: i32, %arg1: i32, %arg2: memref<8x256xf32, #tpu.memory_space<vmem>>, %arg3: memref<8x256xf32, #tpu.memory_space<vmem>>, %arg4: memref<8x256xf32, #tpu.memory_space<vmem>>) attributes {dimension_semantics = [#tpu.dimension_semantics<parallel>, #tpu.dimension_semantics<arbitrary>], iteration_bounds = array<i64: 1, 1>, scalar_prefetch = 0 : i64, scratch_operands = 0 : i64, tpu.core_type = #tpu.core_type<tc>, window_params = [{transform_indices = @transform_0, window_bounds = array<i64: 8, 256>}, {transform_indices = @transform_1, window_bounds = array<i64: 8, 256>}, {transform_indices = @transform_2, window_bounds = array<i64: 8, 256>}]} {
    %c0_i32 = arith.constant 0 : i32
    %0 = arith.cmpi eq, %arg1, %c0_i32 : i32
    %1 = arith.extui %0 : i1 to i32
    %c0_i32_0 = arith.constant 0 : i32
    %2 = arith.cmpi ne, %1, %c0_i32_0 : i32
    scf.if %2 {
      %cst_14 = arith.constant 0.000000e+00 : f32
      %24 = vector.broadcast %cst_14 : f32 to vector<8x256xf32>
      %c0_15 = arith.constant 0 : index
      %c0_16 = arith.constant 0 : index
      %25 = vector.load %arg4[%c0_15, %c0_16] : memref<8x256xf32, #tpu.memory_space<vmem>>, vector<8x256xf32>
      tpu.vector_store %arg4[%c0_15, %c0_16], %24 {strides = array<i32>} : memref<8x256xf32, #tpu.memory_space<vmem>>, vector<8x256xf32>,
    } else {
    }
    %c0 = arith.constant 0 : index
    %c0_1 = arith.constant 0 : index
    %3 = vector.load %arg2[%c0, %c0_1] : memref<8x256xf32, #tpu.memory_space<vmem>>, vector<8x256xf32>
    %c0_2 = arith.constant 0 : index
    %c0_3 = arith.constant 0 : index
    %4 = vector.load %arg3[%c0_2, %c0_3] : memref<8x256xf32, #tpu.memory_space<vmem>>, vector<8x256xf32>
    %cst = arith.constant 1.000000e+00 : f32
    %5 = vector.broadcast %cst : f32 to vector<8x256xf32>
    %6 = arith.cmpf oeq, %4, %5 : vector<8x256xf32>
    %cst_4 = arith.constant 1.000000e-01 : f32
    %7 = vector.broadcast %cst_4 : f32 to vector<8x256xf32>
    %8 = arith.cmpf oeq, %4, %7 : vector<8x256xf32>
    %cst_5 = arith.constant 1.000000e-01 : f32
    %cst_6 = arith.constant 0.000000e+00 : f32
    %9 = vector.broadcast %cst_5 : f32 to vector<8x256xf32>
    %10 = vector.broadcast %cst_6 : f32 to vector<8x256xf32>
    %11 = arith.select %8, %9, %10 : vector<8x256xi1>, vector<8x256xf32>
    %cst_7 = arith.constant 1.000000e+00 : f32
    %12 = vector.broadcast %cst_7 : f32 to vector<8x256xf32>
    %13 = arith.select %6, %12, %11 : vector<8x256xi1>, vector<8x256xf32>
    %cst_8 = arith.constant 1.000000e+00 : f32
    %14 = vector.broadcast %cst_8 : f32 to vector<8x256xf32>
    %15 = arith.subf %3, %14 : vector<8x256xf32>
    %16 = arith.select %6, %15, %3 : vector<8x256xi1>, vector<8x256xf32>
    %17 = arith.mulf %13, %16 : vector<8x256xf32>
    %18 = arith.mulf %17, %16 : vector<8x256xf32>
    %c0_9 = arith.constant 0 : index
    %c0_10 = arith.constant 0 : index
    %19 = vector.load %arg4[%c0_9, %c0_10] : memref<8x256xf32, #tpu.memory_space<vmem>>, vector<8x256xf32>
    %20 = vector.shape_cast %18 : vector<8x256xf32> to vector<1x8x256xf32>
    %cst_11 = arith.constant dense<0.000000e+00> : vector<8x256xf32>
    %21 = vector.multi_reduction <add>, %20, %cst_11 [0] : vector<1x8x256xf32> to vector<8x256xf32>
    %22 = arith.addf %19, %21 : vector<8x256xf32>
    %c0_12 = arith.constant 0 : index
    %c0_13 = arith.constant 0 : index
    %23 = vector.load %arg4[%c0_12, %c0_13] : memref<8x256xf32, #tpu.memory_space<vmem>>, vector<8x256xf32>
    tpu.vector_store %arg4[%c0_12, %c0_13], %22 {strides = array<i32>} : memref<8x256xf32, #tpu.memory_space<vmem>>, vector<8x256xf32>,
    return
  }
  func.func @transform_0(%arg0: i32, %arg1: i32) -> (i32, i32) {
    %c1_i32 = arith.constant 1 : i32
    %0 = arith.muli %arg0, %c1_i32 : i32
    %1 = arith.addi %0, %arg1 : i32
    %c0_i32 = arith.constant 0 : i32
    %c0_i32_0 = arith.constant 0 : i32
    return %1, %c0_i32 : i32, i32
  }
  func.func @transform_1(%arg0: i32, %arg1: i32) -> (i32, i32) {
    %c1_i32 = arith.constant 1 : i32
    %0 = arith.muli %arg0, %c1_i32 : i32
    %1 = arith.addi %0, %arg1 : i32
    %c0_i32 = arith.constant 0 : i32
    %c0_i32_0 = arith.constant 0 : i32
    return %1, %c0_i32 : i32, i32
  }
  func.func @transform_2(%arg0: i32, %arg1: i32) -> (i32, i32) {
    %c0_i32 = arith.constant 0 : i32
    %c0_i32_0 = arith.constant 0 : i32
    return %arg0, %c0_i32 : i32, i32
  }
}

</mosaic_0001>

<bundles_post_ra>
// kernel: loc_loss.1
= control target key start
LH: loop header
LB: loop body
LE: loop exit
PB: predicated region body
PF: predicated region fallthrough
CT: control target
= control target key end

     0   :  { %v104_v3 = vmov 0.0   ;;  %s138_s1 = inlined_call_operand.vmem [shape: f32[8,256], index: 1, kind: input, shape index: {}]   ;;  %s139_s0 = inlined_call_operand.vmem [shape: f32[8,256], index: 0, kind: input, shape index: {}]   ;;  %s140_s2 = inlined_call_operand.vmem [shape: f32[8,256], index: 2, kind: output, shape index: {}]  }
   0x1   :  { %v59_v0 = vld [vmem:[%s138_s1] sm:$0xff]  ;;  %v60_v1 = vld [vmem:[%s138_s1 + $0x8] sm:$0xff] }
   0x2   :  { %v57_v2 = vld [vmem:[%s139_s0] sm:$0xff]  ;;  %vm61_vm0 = vcmp.eq.f32.partialorder %v59_v0, 1.0  ;;  %vm62_vm1 = vcmp.eq.f32.partialorder %v60_v1, 1.0  ;;  %vm63_vm2 = vcmp.eq.f32.partialorder %v59_v0, 0.1  ;;  %v58_v7 = vld [vmem:[%s139_s0 + $0x8] sm:$0xff] }
   0x3   :  { %vm64_vm3 = vcmp.eq.f32.partialorder %v60_v1, 0.1  ;;  %v65_v4 = vsel %vm63_vm2, 0.1, %v104_v3  ;;  %v101_v6 = vadd.f32 -1.0, %v57_v2  ;;  %v102_v10 = vadd.f32 -1.0, %v58_v7 }
   0x4   :  { %v66_v5 = vsel %vm64_vm3, 0.1, %v104_v3  ;;  %v67_v8 = vsel %vm61_vm0, 1.0, %v65_v4 }
   0x5   :  { %v68_v9 = vsel %vm62_vm1, 1.0, %v66_v5  ;;  %v71_v11 = vsel %vm61_vm0, %v101_v6, %v57_v2  ;;  %v72_v13 = vsel %vm62_vm1, %v102_v10, %v58_v7 }
   0x6   :  { %v73_v12 = vmul.f32 %v71_v11, %v67_v8  ;;  %v74_v14 = vmul.f32 %v72_v13, %v68_v9 }
   0x8   :  { %v75_v15 = vmul.f32 %v73_v12, %v71_v11  ;;  %v76_v16 = vmul.f32 %v74_v14, %v72_v13 }
   0xa   :  { %83 = vst [vmem:[%s140_s2] sm:$0xff] %v75_v15 }
   0xb   :  { %84 = vst [vmem:[%s140_s2 + $0x8] sm:$0xff] %v76_v16 }

</bundles_post_ra>
